<compile_context>
chip_gen: v6e
topology: v6e:2x2x1
jax: 0.10.0
libtpu: 0.0.40
codegen_flags: <defaults>
</compile_context>

<pallas_src>
import math

import jax
import jax.numpy as jnp
from jax import lax
from jax.experimental import pallas as pl
from jax.experimental.pallas import tpu as pltpu


def _round_up(x: int, m: int) -> int:
    return ((x + m - 1) // m) * m


def _make_mrae_kernel(tile_rows: int, chunk_rows: int, valid_rows: int,
                      need_mask: bool):
    """Kernel: each grid block emits an (8, 128) f32 partial error sum."""
    nchunks = tile_rows // chunk_rows
    unroll = nchunks <= 8  # fully unroll short fixed loops for LLO visibility

    def kernel(o_ref, l_ref, out_ref):
        block_row0 = pl.program_id(0) * tile_rows

        def block_partial(masked: bool):
            def body(c, acc):
                start = pl.multiple_of(c * chunk_rows, chunk_rows)
                o = o_ref[pl.ds(start, chunk_rows), :].astype(jnp.float32)
                lbl = l_ref[pl.ds(start, chunk_rows), :].astype(jnp.float32)
                err = jnp.abs(o - lbl) / lbl
                # torch.nan_to_num defaults == jnp.nan_to_num defaults:
                #   nan -> 0, +inf -> finfo.max, -inf -> finfo.min.
                # Sanitize BEFORE the ragged mask so garbage in the
                # partially out-of-bounds last block becomes finite, then 0.
                err = jnp.nan_to_num(err)
                if masked:
                    row_ids = (block_row0 + start
                               + lax.broadcasted_iota(jnp.int32,
                                                      (chunk_rows, 128), 0))
                    err = jnp.where(row_ids < valid_rows, err, 0.0)
                # Fold chunk into an (8, 128) vreg-shaped partial: pure VPU
                # adds over the leading (untiled) axis.
                return acc + err.reshape(chunk_rows // 8, 8, 128).sum(axis=0)

            return lax.fori_loop(0, nchunks, body,
                                 jnp.zeros((8, 128), jnp.float32),
                                 unroll=unroll)

        if need_mask:
            is_last = pl.program_id(0) == pl.num_programs(0) - 1

            @pl.when(is_last)
            def _():
                out_ref[...] = block_partial(True)

            @pl.when(jnp.logical_not(is_last))
            def _():
                out_ref[...] = block_partial(False)
        else:
            out_ref[...] = block_partial(False)

    return kernel


def mrae_loss(outputs, label, *, tile_rows: int = 8192,
              vmem_limit_bytes: int = 32 * 1024 * 1024):
    """Mean Relative Absolute Error, matching Loss_MRAE.forward()."""
    assert outputs.shape == label.shape
    n = outputs.size
    o = outputs.reshape(-1)
    l = label.reshape(-1)

    # Lane alignment.  When n is a multiple of 128 (the common case for image
    # tensors) the reshape below is free.  Otherwise pad by <= 127 elements
    # with output == label == 1 (relative error exactly 0).
    # TODO(synk): when n % 128 != 0 this pad copies both inputs through HBM;
    # an in-kernel flat-index lane mask on a 1-D layout would avoid the copy.
    pad = (-n) % 128
    if pad:
        o = jnp.concatenate([o, jnp.ones((pad,), o.dtype)])
        l = jnp.concatenate([l, jnp.ones((pad,), l.dtype)])

    rows = (n + pad) // 128
    o2 = o.reshape(rows, 128)
    l2 = l.reshape(rows, 128)

    # Row tiling: scale by 4/itemsize so narrow dtypes move the same number
    # of bytes per grid step; round to the packed-sublane multiple.
    itemsize = jnp.dtype(outputs.dtype).itemsize
    scale = max(1, 4 // itemsize)
    sub = 8 * scale
    rows_r = _round_up(rows, sub)
    tr = min(int(tile_rows) * scale, rows_r)
    # For larger inputs keep >= 2 grid blocks so the "parallel" axis can feed
    # both TensorCores on v7x megacore.
    if rows_r >= 4096 * scale:
        tr = min(tr, _round_up(-(-rows_r // 2), sub))
    tr = _round_up(tr, sub)

    num_blocks = -(-rows // tr)
    need_mask = (rows % tr) != 0
    # Chunk size for the in-kernel accumulation loop (keeps intermediates
    # register/VMEM-small instead of materializing a full-tile err tensor).
    chunk_rows = math.gcd(tr, 256)

    kernel = _make_mrae_kernel(tr, chunk_rows, rows, need_mask)

    bytes_in = 2 * n * itemsize
    bytes_out = num_blocks * 8 * 128 * 4

    partials = pl.pallas_call(
        kernel,
        out_shape=jax.ShapeDtypeStruct((num_blocks, 8, 128), jnp.float32),
        grid_spec=pltpu.PrefetchScalarGridSpec(
            num_scalar_prefetch=0,
            grid=(num_blocks,),
            in_specs=[
                pl.BlockSpec((tr, 128), lambda i: (i, 0)),
                pl.BlockSpec((tr, 128), lambda i: (i, 0)),
            ],
            out_specs=pl.BlockSpec((None, 8, 128), lambda i: (i, 0, 0)),
        ),
        compiler_params=pltpu.CompilerParams(
            dimension_semantics=("parallel",),
            vmem_limit_bytes=vmem_limit_bytes,
        ),
        cost_estimate=pl.CostEstimate(
            flops=8 * n,
            transcendentals=0,
            bytes_accessed=bytes_in + bytes_out,
        ),
    )(o2, l2)

    # Tiny final reduction + mean normalization outside the kernel.
    return jnp.sum(partials) / jnp.float32(n)


def mrae_ref(outputs, label):
    err = jnp.abs(outputs - label) / label
    err = jnp.nan_to_num(err)
    return jnp.mean(err.reshape(-1))


if __name__ == "__main__":
    key = jax.random.PRNGKey(0)
    k_out, k_lbl = jax.random.split(key)
    shape = (2, 4, 16, 16)  # NCHW, small synthetic shapes
    outputs = jax.random.normal(k_out, shape, dtype=jnp.float32)
    # labels strictly positive (typical for MRAE targets), avoids inf blowup
    label = jax.random.uniform(
        k_lbl, shape, dtype=jnp.float32, minval=0.1, maxval=2.0
    )

    result = jax.block_until_ready(mrae_loss(outputs, label))
    expected = jax.block_until_ready(mrae_ref(outputs, label))

    assert result.shape == ()
    assert jnp.allclose(result, expected, rtol=1e-5, atol=1e-5), (result, expected)
    print("KERNEL_OK")
</pallas_src>

<mosaic_0001>
module attributes {stable_mosaic.version = 11 : i64} {
  func.func @kernel(%arg0: i32, %arg1: memref<16x128xf32, #tpu.memory_space<vmem>>, %arg2: memref<16x128xf32, #tpu.memory_space<vmem>>, %arg3: memref<1x8x128xf32, #tpu.memory_space<vmem>>) attributes {dimension_semantics = [#tpu.dimension_semantics<parallel>], iteration_bounds = array<i64: 1>, scalar_prefetch = 0 : i64, scratch_operands = 0 : i64, tpu.core_type = #tpu.core_type<tc>, window_params = [{transform_indices = @transform_0, window_bounds = array<i64: 16, 128>}, {transform_indices = @transform_1, window_bounds = array<i64: 16, 128>}, {transform_indices = @transform_2, window_bounds = array<i64: 1, 8, 128>}]} {
    %cst = arith.constant 0.000000e+00 : f32
    %0 = vector.broadcast %cst : f32 to vector<8x128xf32>
    %c0_i32 = arith.constant 0 : i32
    %c16_i32 = arith.constant 16 : i32
    %1 = arith.muli %c0_i32, %c16_i32 : i32
    %2 = tpu.assume_multiple %1, 16 : i32
    %3 = arith.index_cast %2 : i32 to index
    %c0 = arith.constant 0 : index
    %4 = vector.load %arg1[%3, %c0] : memref<16x128xf32, #tpu.memory_space<vmem>>, vector<16x128xf32>
    %5 = arith.index_cast %2 : i32 to index
    %c0_0 = arith.constant 0 : index
    %6 = vector.load %arg2[%5, %c0_0] : memref<16x128xf32, #tpu.memory_space<vmem>>, vector<16x128xf32>
    %7 = arith.subf %4, %6 : vector<16x128xf32>
    %8 = math.absf %7 : vector<16x128xf32>
    %9 = arith.divf %8, %6 : vector<16x128xf32>
    %10 = arith.cmpf one, %9, %9 : vector<16x128xf32>
    %cst_1 = arith.constant 0.000000e+00 : f32
    %11 = vector.broadcast %cst_1 : f32 to vector<16x128xf32>
    %12 = arith.select %10, %11, %9 : vector<16x128xi1>, vector<16x128xf32>
    %cst_2 = arith.constant 0x7F800000 : f32
    %13 = vector.broadcast %cst_2 : f32 to vector<16x128xf32>
    %14 = arith.cmpf oeq, %12, %13 : vector<16x128xf32>
    %cst_3 = arith.constant 3.40282347E+38 : f32
    %15 = vector.broadcast %cst_3 : f32 to vector<16x128xf32>
    %16 = arith.select %14, %15, %12 : vector<16x128xi1>, vector<16x128xf32>
    %cst_4 = arith.constant 0xFF800000 : f32
    %17 = vector.broadcast %cst_4 : f32 to vector<16x128xf32>
    %18 = arith.cmpf oeq, %16, %17 : vector<16x128xf32>
    %cst_5 = arith.constant -3.40282347E+38 : f32
    %19 = vector.broadcast %cst_5 : f32 to vector<16x128xf32>
    %20 = arith.select %18, %19, %16 : vector<16x128xi1>, vector<16x128xf32>
    %21 = vector.shape_cast %20 : vector<16x128xf32> to vector<2x8x128xf32>
    %cst_6 = arith.constant dense<0.000000e+00> : vector<8x128xf32>
    %22 = vector.multi_reduction <add>, %21, %cst_6 [0] : vector<2x8x128xf32> to vector<8x128xf32>
    %23 = arith.addf %0, %22 : vector<8x128xf32>
    %c1_i32 = arith.constant 1 : i32
    %c0_7 = arith.constant 0 : index
    %c0_8 = arith.constant 0 : index
    %c0_9 = arith.constant 0 : index
    %24 = vector.load %arg3[%c0_7, %c0_8, %c0_9] : memref<1x8x128xf32, #tpu.memory_space<vmem>>, vector<1x8x128xf32>
    %25 = vector.shape_cast %24 : vector<1x8x128xf32> to vector<8x128xf32>
    %26 = vector.shape_cast %23 : vector<8x128xf32> to vector<1x8x128xf32>
    tpu.vector_store %arg3[%c0_7, %c0_8, %c0_9], %26 {strides = array<i32>} : memref<1x8x128xf32, #tpu.memory_space<vmem>>, vector<1x8x128xf32>,
    return
  }
  func.func @transform_0(%arg0: i32) -> (i32, i32) {
    %c0_i32 = arith.constant 0 : i32
    %c0_i32_0 = arith.constant 0 : i32
    return %arg0, %c0_i32 : i32, i32
  }
  func.func @transform_1(%arg0: i32) -> (i32, i32) {
    %c0_i32 = arith.constant 0 : i32
    %c0_i32_0 = arith.constant 0 : i32
    return %arg0, %c0_i32 : i32, i32
  }
  func.func @transform_2(%arg0: i32) -> (i32, i32, i32) {
    %c0_i32 = arith.constant 0 : i32
    %c0_i32_0 = arith.constant 0 : i32
    %c0_i32_1 = arith.constant 0 : i32
    return %arg0, %c0_i32, %c0_i32_0 : i32, i32, i32
  }
}

</mosaic_0001>

<bundles_post_ra>
// kernel: tpu_custom_call.1
= control target key start
LH: loop header
LB: loop body
LE: loop exit
PB: predicated region body
PF: predicated region fallthrough
CT: control target
= control target key end

     0   :  { %7 = vsyncpa [#allocation3], 0  ;;  %s187_s0 = inlined_call_operand.hbm [shape: f32[16,128], index: 0, kind: input, shape index: {}]   ;;  %s188_s1 = inlined_call_operand.hbm [shape: f32[16,128], index: 1, kind: input, shape index: {}]   ;;  %s189_s2 = inlined_call_operand.hbm [shape: f32[1,8,128], index: 2, kind: output, shape index: {}]  }
   0x1   :  { %8 = vsyncpa [#allocation6], 0 }
   0x2   :  { %9 = vsyncpa [#allocation4], 0  ;;  %s158_s9 = smov [#allocation2]  }
   0x3   :  { %s15_s10 = sshll.u32 %s158_s9, 4  ;;  %s16_s10 = int_to_ptr.vmem [resolvable:$true] %s15_s10 }
   0x4   :  { %s100_s11 = scalar_lea.vmem %s16_s10, 256  ;;  %p105_p1 = scmp.lt.s32.totalorder %s16_s10, %s16_s10 }
   0x5   :  { %p101_p0 = scmp.ne.s32.totalorder %s16_s10, %s100_s11  ;;  %p106_p2 = scmp.lt.s32.totalorder %s100_s11, %s100_s11 }
   0x7   :  { %p107_p3 = por %p106_p2, %p105_p1 }
   0x9   :  { %p108_p4 = pnand %p107_p3, %p101_p0 }
   0xb   :  { %111 = shalt.err (!%p108_p4)
}
   0xc   :  { %s159_s12 = smov 128   ;;  %s160_s13 = smov 8  }
   0xd   :  { %21 = dma.hbm_to_vmem [thread:$0]  %s187_s0, 256, %s16_s10, [#allocation3], %s159_s12, %s159_s12, %s160_s13  }
   0xe   :  { %s161_s16 = smov [#allocation5]  }
   0xf   :  { %s27_s17 = sshll.u32 %s161_s16, 4  ;;  %s28_s17 = int_to_ptr.vmem [resolvable:$true] %s27_s17 }
  0x10   :  { %s120_s18 = scalar_lea.vmem %s28_s17, 256  ;;  %p125_p6 = scmp.lt.s32.totalorder %s28_s17, %s28_s17 }
  0x11   :  { %p121_p5 = scmp.ne.s32.totalorder %s28_s17, %s120_s18  ;;  %p126_p7 = scmp.lt.s32.totalorder %s120_s18, %s120_s18 }
  0x13   :  { %p127_p8 = por %p126_p7, %p125_p6 }
  0x15   :  { %p128_p9 = pnand %p127_p8, %p121_p5 }
  0x17   :  { %131 = shalt.err (!%p128_p9)
}
  0x18   :  { %33 = dma.hbm_to_vmem [thread:$0]  %s188_s1, 256, %s28_s17, [#allocation6], %s159_s12, %s159_s12, %s160_s13  }
  0x19   :  { %152 = dma.done.wait [#allocation3], 256  }
  0x1a   :  { %153 = vsyncadd [#allocation3], 4294967040 }
  0x1b   :  { %154 = dma.done.wait [#allocation6], 256  }
  0x1c   :  { %155 = vsyncadd [#allocation6], 4294967040  ;;  %v42_v0 = vld [vmem:[#allocation5] sm:$0xff]  ;;  %v43_v1 = vld [vmem:[#allocation5 + $0x8] sm:$0xff]  ;;  %s162_s0 = smov [#allocation7]  }
  0x1d   :  { %88 = vrcp.f32 %v42_v0  ;;  %v40_v2 = vld [vmem:[#allocation2] sm:$0xff]  ;;  %v41_v3 = vld [vmem:[#allocation2 + $0x8] sm:$0xff]  ;;  %s73_s1 = sshll.u32 %s162_s0, 4  ;;  %s74_s1 = int_to_ptr.vmem [resolvable:$true] %s73_s1 }
  0x1e   :  { %90 = vrcp.f32 %v43_v1  ;;  %v44_v4 = vsub.f32 %v40_v2, %v42_v0  ;;  %v45_v5 = vsub.f32 %v41_v3, %v43_v1  ;;  %s132_s21 = scalar_lea.vmem %s74_s1, 128  ;;  %p137_p11 = scmp.lt.s32.totalorder %s74_s1, %s74_s1 }
  0x1f   :  { %p133_p10 = scmp.ne.s32.totalorder %s74_s1, %s132_s21  ;;  %p138_p12 = scmp.lt.s32.totalorder %s132_s21, %s132_s21 }
  0x20   :  { %v46_v6 = vand.u32 2147483647, %v44_v4  ;;  %v47_v7 = vand.u32 2147483647, %v45_v5 }
  0x21   :  { %p139_p13 = por %p138_p12, %p137_p11 }
  0x23   :  { %p140_p0 = pnand %p139_p13, %p133_p10 }
  0x2a   :  { %v89_v8 = vpop.eup %88 }
  0x2b   :  { %v91_v9 = vpop.eup %90  ;;  %v49_v10 = vmul.f32 %v89_v8, %v46_v6 }
  0x2c   :  { %v51_v11 = vmul.f32 %v91_v9, %v47_v7 }
  0x2d   :  { %vm52_vm0 = vcmp.ne.f32.partialorder %v49_v10, %v49_v10 }
  0x2e   :  { %vm53_vm1 = vcmp.ne.f32.partialorder %v51_v11, %v51_v11  ;;  %v54_v12 = vsel %vm52_vm0, 0.0, %v49_v10 }
  0x2f   :  { %v55_v13 = vsel %vm53_vm1, 0.0, %v51_v11  ;;  %vm56_vm2 = vcmp.eq.f32.partialorder %v54_v12, inf }
  0x30   :  { %vm57_vm3 = vcmp.eq.f32.partialorder %v55_v13, inf  ;;  %v58_v14 = vsel %vm56_vm2, 3.4028235e+38, %v54_v12 }
  0x31   :  { %v59_v15 = vsel %vm57_vm3, 3.4028235e+38, %v55_v13  ;;  %vm60_vm4 = vcmp.eq.f32.partialorder %v58_v14, -inf }
  0x32   :  { %vm61_vm5 = vcmp.eq.f32.partialorder %v59_v15, -inf  ;;  %v62_v16 = vsel %vm60_vm4, -3.4028235e+38, %v58_v14 }
  0x33   :  { %v63_v17 = vsel %vm61_vm5, -3.4028235e+38, %v59_v15 }
  0x34   :  { %v64_v18 = vadd.f32 %v63_v17, %v62_v16 }
  0x36   :  { %66 = vst [vmem:[#allocation7] sm:$0xff] %v64_v18 }
  0x37   :  { %143 = shalt.err (!%p140_p0)
}
  0x38   :  { %76 = dma.vmem_to_hbm [thread:$0]  %s74_s1, 128, %s189_s2, [#allocation4]  }
  0x39   :  { %156 = dma.done.wait [#allocation4], 128  }
  0x3a   :  { %157 = vsyncadd [#allocation4], 4294967168 }
  0x3b   :  { %80 = vsyncpa [#allocation3], 1 }
  0x3c   :  { %81 = vsyncpa [#allocation6], 1 }
  0x3d   :  { %82 = vsyncpa [#allocation4], 1 }

</bundles_post_ra>
